<compile_context>
chip_gen: v7x
topology: tpu7x:2x2x1
jax: 0.10.0
libtpu: 0.0.40
codegen_flags: <defaults>
</compile_context>

<pallas_src>
import functools

import jax
import jax.numpy as jnp
from jax.experimental import pallas as pl
from jax.experimental.pallas import tpu as pltpu

INPUT_DIM = 5
HIDDEN = (64, 32, 16)
OUTPUT_DIM = 1

CORRECTIONS = {
    "bias_correction": 0.074,
    "sar_sensitivity": 0.08,
    "sar_offset": -18.0,
    "moisture_scaling": 0.8,
}
# Fold the divide into a single multiply: moisture_scaling / (sar_sensitivity * 100) == 0.1
_SAR_SCALE = CORRECTIONS["moisture_scaling"] / (CORRECTIONS["sar_sensitivity"] * 100.0)

_VMEM_LIMIT = 32 * 1024 * 1024  # explicit scoped-VMEM budget (raises v5e's 16 MiB default)


def _round_up(v, m):
    return pl.cdiv(v, m) * m


def _default_act_dtype():
    """bf16 compute on v6e/v7x (bf16 VPU/EUP, cheaper MXU passes); f32 on v5e and older."""
    try:
        kind = jax.devices()[0].device_kind.lower()
    except Exception:
        return jnp.float32
    if any(tag in kind for tag in ("v6", "v7", "7x")):
        return jnp.bfloat16
    return jnp.float32


# ----------------------------- forward kernel ------------------------------ #
def _pinn_kernel(x_ref, w1, b1, w2, b2, w3, b3, w4, b4, o_ref, *, act_dtype):
    # Feature-major: x_ref is (5, tile_b); w1..w3 are (out, in); b1..b3 are (out, 1);
    # w4 is (16, 1); b4 is (1, 1).  Batch sits on the lane axis throughout.
    x = x_ref[...].astype(act_dtype)  # in-kernel cast (no wrapper astype pass over x)

    # Layer 1: Linear(5 -> 64) + Tanh   (Dropout = identity at inference)
    h = jnp.tanh(
        (jnp.dot(w1[...], x, preferred_element_type=jnp.float32) + b1[...]).astype(act_dtype)
    )
    # Layer 2: Linear(64 -> 32) + Tanh
    h = jnp.tanh(
        (jnp.dot(w2[...], h, preferred_element_type=jnp.float32) + b2[...]).astype(act_dtype)
    )
    # Layer 3: Linear(32 -> 16) + Tanh
    h = jnp.tanh(
        (jnp.dot(w3[...], h, preferred_element_type=jnp.float32) + b3[...]).astype(act_dtype)
    )
    # Layer 4: Linear(16 -> 1) + Sigmoid, off the MXU:
    # lane-broadcast multiply (VPU) + 16-sublane reduce (XLU) -> (1, tile_b), lane-dense.
    z = jnp.sum(h * w4[...], axis=0, keepdims=True) + b4[...]  # f32 (w4/b4 are f32)
    o_ref[...] = jax.nn.sigmoid(z).astype(o_ref.dtype)
    # TODO(synk): training-mode Dropout(0.1) (pltpu.prng_random_bits mask) not implemented;
    # forward matches PyTorch eval() semantics.


def pinn_forward(x, params, *, tile_b=8192, act_dtype=None):
    """x: (B, 5), params dict of (in,out) weights / (1,out) biases. Returns (B, 1) f32.

    Ragged B is handled with overhanging last blocks (no full-array padding).
    act_dtype=None auto-selects bf16 on v6e/v7x and f32 on v5e/older.
    """
    B, D = x.shape
    assert D == INPUT_DIM
    if act_dtype is None:
        act_dtype = _default_act_dtype()

    # Batch tile: multiple of 128, ceiling 16K (default 8192), and capped at
    # round_up_128(ceil(B/2)) so the grid has >= 2 steps whenever B allows it
    # (v7x megacore sharding + DMA/compute overlap).
    tile_b = max(128, min(int(tile_b), 16384))
    tile_b = _round_up(tile_b, 128)
    tile_b = min(tile_b, max(128, _round_up(pl.cdiv(B, 2), 128)))
    grid = pl.cdiv(B, tile_b)

    # Single wrapper-side layout op: transpose to feature-major (5, B).  This one
    # extra HBM pass buys batch-on-lanes inside the kernel (3-5x better MXU/EUP
    # utilization than batch-major); no pad / no astype passes remain.
    x_t = x.T

    # Weight prep (tiny arrays; negligible): w1..w3 -> (out, in) in act_dtype,
    # biases -> (out, 1) f32, w4 stays (in=16, out=1) f32 for the VPU/XLU layer.
    w1 = params["w1"].T.astype(act_dtype)
    w2 = params["w2"].T.astype(act_dtype)
    w3 = params["w3"].T.astype(act_dtype)
    b1 = params["b1"].T.astype(jnp.float32)
    b2 = params["b2"].T.astype(jnp.float32)
    b3 = params["b3"].T.astype(jnp.float32)
    w4 = params["w4"].astype(jnp.float32)          # (16, 1)
    b4 = params["b4"].astype(jnp.float32)          # (1, 1)

    full = lambda a: pl.BlockSpec(a.shape, lambda i: (0, 0))  # resident across grid steps

    out = pl.pallas_call(
        functools.partial(_pinn_kernel, act_dtype=act_dtype),
        out_shape=jax.ShapeDtypeStruct((OUTPUT_DIM, B), jnp.float32),
        grid_spec=pltpu.PrefetchScalarGridSpec(
            num_scalar_prefetch=0,
            grid=(grid,),
            in_specs=[
                pl.BlockSpec((INPUT_DIM, tile_b), lambda i: (0, i)),
                full(w1), full(b1),
                full(w2), full(b2),
                full(w3), full(b3),
                full(w4), full(b4),
            ],
            out_specs=pl.BlockSpec((OUTPUT_DIM, tile_b), lambda i: (0, i)),
        ),
        compiler_params=pltpu.CompilerParams(
            dimension_semantics=("parallel",),
            vmem_limit_bytes=_VMEM_LIMIT,
        ),
    )(x_t, w1, b1, w2, b2, w3, b3, w4, b4)

    # (1, B) row-major == (B, 1) row-major -> free reshape.
    return out.reshape(B, OUTPUT_DIM)


# ------------------------- apply_corrections kernel ------------------------ #
def _corrections_kernel(sar_ref, opt_ref, out_ref):
    sar_m = jnp.clip((sar_ref[...] - CORRECTIONS["sar_offset"]) * _SAR_SCALE, 0.0, 1.0)
    opt_m = jnp.clip(1.0 - opt_ref[...] * 0.8, 0.15, 0.6)
    combined = 0.6 * sar_m + 0.4 * opt_m
    out_ref[...] = jnp.clip(combined - CORRECTIONS["bias_correction"], 0.05, 0.8)


def apply_corrections(sar_data, optical_data, *, lanes=1024, tile_rows=512):
    """Elementwise sensor-correction path, tiled & pipelined for any shape.

    Wrapper cost: free reshapes + at most ONE pad (only when size % lanes != 0);
    the last row-block overhangs instead of padding rows.
    """
    assert sar_data.shape == optical_data.shape
    orig_shape = sar_data.shape
    n = sar_data.size

    sar = jnp.asarray(sar_data, jnp.float32).reshape(-1)   # reshape of contiguous = free
    opt = jnp.asarray(optical_data, jnp.float32).reshape(-1)

    rows = pl.cdiv(n, lanes)
    pad = rows * lanes - n
    if pad:
        sar = jnp.pad(sar, (0, pad))
        opt = jnp.pad(opt, (0, pad))
    sar2 = sar.reshape(rows, lanes)
    opt2 = opt.reshape(rows, lanes)

    # Row tile: multiple of 8, default 512 (2 MiB/block -> ~85% of HBM roofline),
    # clamped so the grid keeps >= 2 steps when the data allows (v7x).
    tile_rows = max(8, min(int(tile_rows), 2048))
    tile_rows = _round_up(tile_rows, 8)
    tile_rows = min(tile_rows, max(8, _round_up(pl.cdiv(rows, 2), 8)))
    grid = pl.cdiv(rows, tile_rows)

    out = pl.pallas_call(
        _corrections_kernel,
        out_shape=jax.ShapeDtypeStruct((rows, lanes), jnp.float32),
        grid_spec=pltpu.PrefetchScalarGridSpec(
            num_scalar_prefetch=0,
            grid=(grid,),
            in_specs=[
                pl.BlockSpec((tile_rows, lanes), lambda i: (i, 0)),
                pl.BlockSpec((tile_rows, lanes), lambda i: (i, 0)),
            ],
            out_specs=pl.BlockSpec((tile_rows, lanes), lambda i: (i, 0)),
        ),
        compiler_params=pltpu.CompilerParams(
            dimension_semantics=("parallel",),
            vmem_limit_bytes=_VMEM_LIMIT,
        ),
    )(sar2, opt2)

    return out.reshape(-1)[:n].reshape(orig_shape)


# ------------------------------ param init --------------------------------- #
def init_params(key):
    """Deterministic init mimicking nn.Linear's uniform(-1/sqrt(fan_in), +)."""
    dims = (INPUT_DIM,) + HIDDEN + (OUTPUT_DIM,)
    params = {}
    for li, (fan_in, fan_out) in enumerate(zip(dims[:-1], dims[1:]), start=1):
        key, kw, kb = jax.random.split(key, 3)
        bound = 1.0 / jnp.sqrt(fan_in)
        params[f"w{li}"] = jax.random.uniform(
            kw, (fan_in, fan_out), jnp.float32, -bound, bound
        )
        params[f"b{li}"] = jax.random.uniform(
            kb, (1, fan_out), jnp.float32, -bound, bound
        )
    return params


def pinn_forward_ref(x, params):
    """Pure-JAX reference (eval-mode PyTorch math)."""
    h = x
    for li in range(1, 4):
        h = jnp.tanh(h @ params[f"w{li}"] + params[f"b{li}"])
    return jax.nn.sigmoid(h @ params["w4"] + params["b4"])


def apply_corrections_ref(sar, opt):
    sar_m = jnp.clip(
        (sar - CORRECTIONS["sar_offset"])
        / (CORRECTIONS["sar_sensitivity"] * 100.0)
        * CORRECTIONS["moisture_scaling"], 0.0, 1.0)
    opt_m = jnp.clip(1.0 - opt * 0.8, 0.15, 0.6)
    return jnp.clip(0.6 * sar_m + 0.4 * opt_m - CORRECTIONS["bias_correction"], 0.05, 0.8)


# ---------------------------------- main ------------------------------------ #
if __name__ == "__main__":
    key = jax.random.PRNGKey(0)
    k_param, k_x, k_x2, k_sar, k_opt, k_sar2, k_opt2 = jax.random.split(key, 7)

    params = init_params(k_param)

    # Small ragged batch (single overhanging block).
    B = 70
    x = jax.random.normal(k_x, (B, INPUT_DIM), jnp.float32)
    ref = pinn_forward_ref(x, params)

    out_f32 = jax.block_until_ready(pinn_forward(x, params, act_dtype=jnp.float32))
    assert out_f32.shape == (B, OUTPUT_DIM)
    assert jnp.allclose(out_f32, ref, atol=2e-5, rtol=2e-5)

    # Auto precision (bf16 on v6e/v7x, f32 on v5e/older) -> looser tolerance if bf16.
    auto_dtype = _default_act_dtype()
    out_auto = jax.block_until_ready(pinn_forward(x, params))
    tol = 2e-5 if auto_dtype == jnp.float32 else 5e-2
    assert jnp.allclose(out_auto, ref, atol=tol, rtol=tol)

    # Larger ragged batch: exercises grid >= 2 (megacore split) + overhanging last tile.
    B2 = 1000
    x2 = jax.random.normal(k_x2, (B2, INPUT_DIM), jnp.float32)
    out2 = jax.block_until_ready(pinn_forward(x2, params, act_dtype=jnp.float32))
    assert out2.shape == (B2, OUTPUT_DIM)
    assert jnp.allclose(out2, pinn_forward_ref(x2, params), atol=2e-5, rtol=2e-5)

    # Sensor-correction path: lane-aligned shape (no pad) ...
    sar = jax.random.normal(k_sar, (8, 128), jnp.float32) * 5.0 - 15.0
    opt = jax.random.uniform(k_opt, (8, 128), jnp.float32)
    corr = jax.block_until_ready(apply_corrections(sar, opt))
    assert corr.shape == sar.shape
    assert jnp.allclose(corr, apply_corrections_ref(sar, opt), atol=1e-5)

    # ... and a ragged shape (single-pad path + overhanging row block).
    sar_r = jax.random.normal(k_sar2, (37, 53), jnp.float32) * 5.0 - 15.0
    opt_r = jax.random.uniform(k_opt2, (37, 53), jnp.float32)
    corr_r = jax.block_until_ready(apply_corrections(sar_r, opt_r))
    assert corr_r.shape == sar_r.shape
    assert jnp.allclose(corr_r, apply_corrections_ref(sar_r, opt_r), atol=1e-5)

    print("KERNEL_OK")
</pallas_src>

<mosaic_0001>
module attributes {stable_mosaic.version = 11 : i64} {
  func.func @_pinn_kernel(%arg0: i32, %arg1: memref<5x128xf32, #tpu.memory_space<vmem>>, %arg2: memref<64x5xf32, #tpu.memory_space<vmem>>, %arg3: memref<64x1xf32, #tpu.memory_space<vmem>>, %arg4: memref<32x64xf32, #tpu.memory_space<vmem>>, %arg5: memref<32x1xf32, #tpu.memory_space<vmem>>, %arg6: memref<16x32xf32, #tpu.memory_space<vmem>>, %arg7: memref<16x1xf32, #tpu.memory_space<vmem>>, %arg8: memref<16x1xf32, #tpu.memory_space<vmem>>, %arg9: memref<1x1xf32, #tpu.memory_space<vmem>>, %arg10: memref<1x128xf32, #tpu.memory_space<vmem>>) attributes {dimension_semantics = [#tpu.dimension_semantics<parallel>], iteration_bounds = array<i64: 1>, scalar_prefetch = 0 : i64, scratch_operands = 0 : i64, tpu.core_type = #tpu.core_type<tc>, window_params = [{transform_indices = @transform_0, window_bounds = array<i64: 5, 128>}, {pipeline_mode = #tpu.pipeline_mode<synchronous>, transform_indices = @transform_1, window_bounds = array<i64: 64, 5>}, {pipeline_mode = #tpu.pipeline_mode<synchronous>, transform_indices = @transform_2, window_bounds = array<i64: 64, 1>}, {pipeline_mode = #tpu.pipeline_mode<synchronous>, transform_indices = @transform_3, window_bounds = array<i64: 32, 64>}, {pipeline_mode = #tpu.pipeline_mode<synchronous>, transform_indices = @transform_4, window_bounds = array<i64: 32, 1>}, {pipeline_mode = #tpu.pipeline_mode<synchronous>, transform_indices = @transform_5, window_bounds = array<i64: 16, 32>}, {pipeline_mode = #tpu.pipeline_mode<synchronous>, transform_indices = @transform_6, window_bounds = array<i64: 16, 1>}, {pipeline_mode = #tpu.pipeline_mode<synchronous>, transform_indices = @transform_7, window_bounds = array<i64: 16, 1>}, {pipeline_mode = #tpu.pipeline_mode<synchronous>, transform_indices = @transform_8, window_bounds = array<i64: 1, 1>}, {transform_indices = @transform_9, window_bounds = array<i64: 1, 128>}]} {
    %c0 = arith.constant 0 : index
    %c0_0 = arith.constant 0 : index
    %0 = vector.load %arg1[%c0, %c0_0] : memref<5x128xf32, #tpu.memory_space<vmem>>, vector<5x128xf32>
    %c0_1 = arith.constant 0 : index
    %c0_2 = arith.constant 0 : index
    %1 = vector.load %arg2[%c0_1, %c0_2] : memref<64x5xf32, #tpu.memory_space<vmem>>, vector<64x5xf32>
    %cst = arith.constant dense<0.000000e+00> : vector<64x128xf32>
    %2 = tpu.matmul %1, %0, %cst {dimension_numbers = #tpu.dot_dimension_numbers<[1], [0], [0], [1], [0, 0, 1, 1], [], []>} : vector<64x5xf32>, vector<5x128xf32>, vector<64x128xf32> -> vector<64x128xf32>
    %c0_3 = arith.constant 0 : index
    %c0_4 = arith.constant 0 : index
    %3 = vector.load %arg3[%c0_3, %c0_4] : memref<64x1xf32, #tpu.memory_space<vmem>>, vector<64x1xf32>
    %4 = vector.broadcast %3 : vector<64x1xf32> to vector<64x128xf32>
    %5 = arith.addf %2, %4 : vector<64x128xf32>
    %6 = math.tanh %5 : vector<64x128xf32>
    %c0_5 = arith.constant 0 : index
    %c0_6 = arith.constant 0 : index
    %7 = vector.load %arg4[%c0_5, %c0_6] : memref<32x64xf32, #tpu.memory_space<vmem>>, vector<32x64xf32>
    %cst_7 = arith.constant dense<0.000000e+00> : vector<32x128xf32>
    %8 = tpu.matmul %7, %6, %cst_7 {dimension_numbers = #tpu.dot_dimension_numbers<[1], [0], [0], [1], [0, 0, 1, 1], [], []>} : vector<32x64xf32>, vector<64x128xf32>, vector<32x128xf32> -> vector<32x128xf32>
    %c0_8 = arith.constant 0 : index
    %c0_9 = arith.constant 0 : index
    %9 = vector.load %arg5[%c0_8, %c0_9] : memref<32x1xf32, #tpu.memory_space<vmem>>, vector<32x1xf32>
    %10 = vector.broadcast %9 : vector<32x1xf32> to vector<32x128xf32>
    %11 = arith.addf %8, %10 : vector<32x128xf32>
    %12 = math.tanh %11 : vector<32x128xf32>
    %c0_10 = arith.constant 0 : index
    %c0_11 = arith.constant 0 : index
    %13 = vector.load %arg6[%c0_10, %c0_11] : memref<16x32xf32, #tpu.memory_space<vmem>>, vector<16x32xf32>
    %cst_12 = arith.constant dense<0.000000e+00> : vector<16x128xf32>
    %14 = tpu.matmul %13, %12, %cst_12 {dimension_numbers = #tpu.dot_dimension_numbers<[1], [0], [0], [1], [0, 0, 1, 1], [], []>} : vector<16x32xf32>, vector<32x128xf32>, vector<16x128xf32> -> vector<16x128xf32>
    %c0_13 = arith.constant 0 : index
    %c0_14 = arith.constant 0 : index
    %15 = vector.load %arg7[%c0_13, %c0_14] : memref<16x1xf32, #tpu.memory_space<vmem>>, vector<16x1xf32>
    %16 = vector.broadcast %15 : vector<16x1xf32> to vector<16x128xf32>
    %17 = arith.addf %14, %16 : vector<16x128xf32>
    %18 = math.tanh %17 : vector<16x128xf32>
    %c0_15 = arith.constant 0 : index
    %c0_16 = arith.constant 0 : index
    %19 = vector.load %arg8[%c0_15, %c0_16] : memref<16x1xf32, #tpu.memory_space<vmem>>, vector<16x1xf32>
    %20 = vector.broadcast %19 : vector<16x1xf32> to vector<16x128xf32>
    %21 = arith.mulf %18, %20 : vector<16x128xf32>
    %cst_17 = arith.constant dense<0.000000e+00> : vector<128xf32>
    %22 = vector.multi_reduction <add>, %21, %cst_17 [0] : vector<16x128xf32> to vector<128xf32>
    %23 = vector.shape_cast %22 : vector<128xf32> to vector<1x128xf32>
    %c0_18 = arith.constant 0 : index
    %c0_19 = arith.constant 0 : index
    %24 = vector.load %arg9[%c0_18, %c0_19] : memref<1x1xf32, #tpu.memory_space<vmem>>, vector<1x1xf32>
    %25 = vector.broadcast %24 : vector<1x1xf32> to vector<1x128xf32>
    %26 = arith.addf %23, %25 : vector<1x128xf32>
    %27 = arith.negf %26 : vector<1x128xf32>
    %28 = math.exp %27 : vector<1x128xf32>
    %cst_20 = arith.constant 1.000000e+00 : f32
    %29 = vector.broadcast %cst_20 : f32 to vector<1x128xf32>
    %30 = arith.addf %29, %28 : vector<1x128xf32>
    %31 = arith.divf %29, %30 : vector<1x128xf32>
    %c0_21 = arith.constant 0 : index
    %c0_22 = arith.constant 0 : index
    %32 = vector.load %arg10[%c0_21, %c0_22] : memref<1x128xf32, #tpu.memory_space<vmem>>, vector<1x128xf32>
    tpu.vector_store %arg10[%c0_21, %c0_22], %31 {strides = array<i32>} : memref<1x128xf32, #tpu.memory_space<vmem>>, vector<1x128xf32>,
    return
  }
  func.func @transform_0(%arg0: i32) -> (i32, i32) {
    %c0_i32 = arith.constant 0 : i32
    %c0_i32_0 = arith.constant 0 : i32
    return %c0_i32, %arg0 : i32, i32
  }
  func.func @transform_1(%arg0: i32) -> (i32, i32) {
    %c0_i32 = arith.constant 0 : i32
    %c0_i32_0 = arith.constant 0 : i32
    %c0_i32_1 = arith.constant 0 : i32
    return %c0_i32, %c0_i32_0 : i32, i32
  }
  func.func @transform_2(%arg0: i32) -> (i32, i32) {
    %c0_i32 = arith.constant 0 : i32
    %c0_i32_0 = arith.constant 0 : i32
    %c0_i32_1 = arith.constant 0 : i32
    return %c0_i32, %c0_i32_0 : i32, i32
  }
  func.func @transform_3(%arg0: i32) -> (i32, i32) {
    %c0_i32 = arith.constant 0 : i32
    %c0_i32_0 = arith.constant 0 : i32
    %c0_i32_1 = arith.constant 0 : i32
    return %c0_i32, %c0_i32_0 : i32, i32
  }
  func.func @transform_4(%arg0: i32) -> (i32, i32) {
    %c0_i32 = arith.constant 0 : i32
    %c0_i32_0 = arith.constant 0 : i32
    %c0_i32_1 = arith.constant 0 : i32
    return %c0_i32, %c0_i32_0 : i32, i32
  }
  func.func @transform_5(%arg0: i32) -> (i32, i32) {
    %c0_i32 = arith.constant 0 : i32
    %c0_i32_0 = arith.constant 0 : i32
    %c0_i32_1 = arith.constant 0 : i32
    return %c0_i32, %c0_i32_0 : i32, i32
  }
  func.func @transform_6(%arg0: i32) -> (i32, i32) {
    %c0_i32 = arith.constant 0 : i32
    %c0_i32_0 = arith.constant 0 : i32
    %c0_i32_1 = arith.constant 0 : i32
    return %c0_i32, %c0_i32_0 : i32, i32
  }
  func.func @transform_7(%arg0: i32) -> (i32, i32) {
    %c0_i32 = arith.constant 0 : i32
    %c0_i32_0 = arith.constant 0 : i32
    %c0_i32_1 = arith.constant 0 : i32
    return %c0_i32, %c0_i32_0 : i32, i32
  }
  func.func @transform_8(%arg0: i32) -> (i32, i32) {
    %c0_i32 = arith.constant 0 : i32
    %c0_i32_0 = arith.constant 0 : i32
    %c0_i32_1 = arith.constant 0 : i32
    return %c0_i32, %c0_i32_0 : i32, i32
  }
  func.func @transform_9(%arg0: i32) -> (i32, i32) {
    %c0_i32 = arith.constant 0 : i32
    %c0_i32_0 = arith.constant 0 : i32
    return %c0_i32, %arg0 : i32, i32
  }
}

</mosaic_0001>

<bundles_post_ra>
// kernel: tpu_custom_call.1
= control target key start
LH: loop header
LB: loop body
LE: loop exit
PB: predicated region body
PF: predicated region fallthrough
CT: control target
= control target key end

     0   :  { %s863_s0 = inlined_call_operand.vmem [shape: f32[5,70], index: 0, kind: input, shape index: {}]   ;;  %s864_s1 = inlined_call_operand.vmem [shape: f32[64,5], index: 1, kind: input, shape index: {}]   ;;  %s865_s2 = inlined_call_operand.vmem [shape: f32[64,1], index: 2, kind: input, shape index: {}]   ;;  %s866_s3 = inlined_call_operand.vmem [shape: f32[32,64], index: 3, kind: input, shape index: {}]   ;;  %s867_s4 = inlined_call_operand.vmem [shape: f32[32,1], index: 4, kind: input, shape index: {}]   ;;  %s868_s5 = inlined_call_operand.vmem [shape: f32[16,32], index: 5, kind: input, shape index: {}]   ;;  %s869_s6 = inlined_call_operand.vmem [shape: f32[16,1], index: 6, kind: input, shape index: {}]   ;;  %s870_s7 = inlined_call_operand.vmem [shape: f32[16,1], index: 7, kind: input, shape index: {}]   ;;  %s871_s8 = inlined_call_operand.<no memory space> [shape: f32[1,1], index: 8, kind: input, shape index: {}]   ;;  %s872_s9 = inlined_call_operand.hbm [shape: f32[1,70], index: 9, kind: output, shape index: {}]  }
   0x1   :  { %v14_v0 = vstv %s871_s8 }
   0x2   :  { %15 = vst [vmem:[#allocation2] sm:$0x1] %v14_v0 }
   0x3   :  { %v35_v1 = vld [vmem:[%s863_s0] sm:$0x1f]  ;;  %vm117_vm0 = vcmask 1044480   ;;  %vm92_vm1 = vcmask 39936   ;;  %v37_v3 = vld [vmem:[%s864_s1 + $0x8] sm:$0xff]  ;;  %v38_v4 = vld [vmem:[%s864_s1 + $0x10] sm:$0xff] }
   0x4   :  { %v36_v2 = vld [vmem:[%s864_s1] sm:$0xff]  ;;  %558 = vmatprep.subr.msk.mxu0 %vm117_vm0, %v35_v1  ;;  %v689_v5 = vmov 0   ;;  %v46_v7 = vld [vmem:[%s865_s2 + $0x10] sm:$0xff]  ;;  %v39_v8 = vld [vmem:[%s864_s1 + $0x18] sm:$0xff] }
   0x5   :  { %560 = vmatprep.mubr.msk.f32.mxu0 %vm92_vm1, %v36_v2  ;;  %559 = vmatpush3.msk.msra.mxu0 %vm117_vm0, %v35_v1  ;;  %v44_v6 = vld [vmem:[%s865_s2] sm:$0xff]  ;;  %v45_v10 = vld [vmem:[%s865_s2 + $0x8] sm:$0xff]  ;;  %v47_v11 = vld [vmem:[%s865_s2 + $0x18] sm:$0xff] }
   0x6   :  { %631 = vset.pattern.permute.xlu0 %v689_v5  ;;  %561 = vmatmul.mubr.msk.f32.vlgmr.msra.gmra.mrb[0].mxu0 %vm92_vm1, %v37_v3  ;;  %v40_v9 = vld [vmem:[%s864_s1 + $0x20] sm:$0xff]  ;;  %v41_v12 = vld [vmem:[%s864_s1 + $0x28] sm:$0xff] }
   0x7   :  { %632 = vset.pattern.permute.xlu1 %v689_v5  ;;  %563 = vmatprep.mubr.msk.f32.mxu0 %vm92_vm1, %v38_v4 }
   0x8   :  { %54 = vperm.xlu0 %631, %v44_v6   ;;  %64 = vperm.xlu1 %632, %v46_v7  }
   0xa   :  { %564 = vmatmul.mubr.msk.f32.gmra.mrb[2].mxu0 %vm92_vm1, %v39_v8 }
   0xb   :  { %566 = vmatprep.mubr.msk.f32.mxu0 %vm92_vm1, %v40_v9 }
   0xc   :  { %59 = vperm.xlu0 %631, %v45_v10  }
   0xd   :  { %16 = vsyncpa [#allocation4], 0  ;;  %v42_v13 = vld [vmem:[%s864_s1 + $0x30] sm:$0xff]  ;;  %v48_v14 = vld [vmem:[%s865_s2 + $0x20] sm:$0xff]  ;;  %69 = vperm.xlu1 %632, %v47_v11   ;;  %vm262_vm2 = vcmask 523264   ;;  %vm378_vm3 = vcmask 261120  }
   0xe   :  { %v49_v15 = vld [vmem:[%s865_s2 + $0x28] sm:$0xff]  ;;  %567 = vmatmul.mubr.msk.f32.gmra.mrb[4].mxu0 %vm92_vm1, %v41_v12  ;;  %v43_v16 = vld [vmem:[%s864_s1 + $0x38] sm:$0xff]  ;;  %v50_v17 = vld [vmem:[%s865_s2 + $0x30] sm:$0xff] }
   0xf   :  { %569 = vmatprep.mubr.msk.f32.mxu0 %vm92_vm1, %v42_v13  ;;  %v51_v18 = vld [vmem:[%s865_s2 + $0x38] sm:$0xff]  ;;  %v238_v19 = vld [vmem:[%s867_s4] sm:$0xff]  ;;  %v239_v20 = vld [vmem:[%s867_s4 + $0x8] sm:$0xff] }
  0x10   :  { %74 = vperm.xlu0 %631, %v48_v14   ;;  %v240_v21 = vld [vmem:[%s867_s4 + $0x10] sm:$0xff]  ;;  %v241_v22 = vld [vmem:[%s867_s4 + $0x18] sm:$0xff]  ;;  %v366_v23 = vld [vmem:[%s869_s6] sm:$0xff] }
  0x11   :  { %79 = vperm.xlu1 %632, %v49_v15   ;;  %v367_v24 = vld [vmem:[%s869_s6 + $0x8] sm:$0xff]  ;;  %v462_v25 = vld [vmem:[%s870_s7] sm:$0xff]  ;;  %v236_v2 = vld [vmem:[%s866_s3 + $0x10] sm:$0xff] }
  0x12   :  { %570 = vmatmul.mubr.msk.f32.gmra.mrb[6].mxu0 %vm92_vm1, %v43_v16  ;;  %v463_v26 = vld [vmem:[%s870_s7 + $0x8] sm:$0xff]  ;;  %v483_v27 = vld [vmem:[#allocation2] sm:$0x1]  ;;  %v237_v3 = vld [vmem:[%s866_s3 + $0x18] sm:$0xff] }
  0x13   :  { %v234_v28 = vld [vmem:[%s866_s3] sm:$0xff]  ;;  %v235_v1 = vld [vmem:[%s866_s3 + $0x8] sm:$0xff] }
  0x14   :  { %84 = vperm.xlu0 %631, %v50_v17   ;;  %588 = vmatprep.mubr.msk.f32.mxu1 %vm262_vm2, %v234_v28  ;;  %v364_v4 = vld [vmem:[%s868_s5] sm:$0xff] }
  0x15   :  { %89 = vperm.xlu1 %632, %v51_v18   ;;  %602 = vmatprep.mubr.msk.f32.mxu0 %vm378_vm3, %v364_v4 }
  0x18   :  { %244 = vperm.xlu0 %631, %v238_v19  }
  0x19   :  { %249 = vperm.xlu1 %632, %v239_v20  }
  0x1c   :  { %254 = vperm.xlu0 %631, %v240_v21  }
  0x1d   :  { %259 = vperm.xlu1 %632, %v241_v22  }
  0x20   :  { %370 = vperm.xlu0 %631, %v366_v23   ;;  %v365_v23 = vld [vmem:[%s868_s5 + $0x8] sm:$0xff]  ;;  %s690_s5 = smov [#allocation3]  }
  0x21   :  { %375 = vperm.xlu1 %632, %v367_v24   ;;  %s507_s19 = sshll.u32 %s690_s5, 4  ;;  %s508_s19 = int_to_ptr.vmem [resolvable:$true] %s507_s19 }
  0x22   :  { %s665_s20 = scalar_lea.vmem %s508_s19, 16  ;;  %s669_s21 = scalar_lea.vmem %s508_s19, 32 }
  0x23   :  { %p666_p0 = scmp.ne.s32.totalorder %s508_s19, %s665_s20  ;;  %p670_p1 = scmp.lt.s32.totalorder %s508_s19, %s508_s19 }
  0x24   :  { %466 = vperm.xlu0 %631, %v462_v25   ;;  %p671_p2 = scmp.lt.s32.totalorder %s669_s21, %s665_s20 }
  0x25   :  { %471 = vperm.xlu1 %632, %v463_v26  }
  0x26   :  { %p672_p3 = por %p671_p2, %p670_p1 }
  0x28   :  { %486 = vperm.xlu0 %631, %v483_v27   ;;  %p673_p4 = pnand %p672_p3, %p666_p0 }
  0x87   :  { %v55_v29 = vpop.permute.xlu0 %54  ;;  %v65_v30 = vpop.permute.xlu1 %64 }
  0x8b   :  { %v60_v31 = vpop.permute.xlu0 %59 }
  0x8c   :  { %v70_v32 = vpop.permute.xlu1 %69 }
  0x8f   :  { %v75_v42 = vpop.permute.xlu0 %74 }
  0x90   :  { %v80_v40 = vpop.permute.xlu1 %79 }
  0x93   :  { %v85_v50 = vpop.permute.xlu0 %84 }
  0x94   :  { %v90_v47 = vpop.permute.xlu1 %89 }
  0x97   :  { %v245_v6 = vpop.permute.xlu0 %244 }
  0x98   :  { %v250_v5 = vpop.permute.xlu1 %249 }
  0x9b   :  { %v255_v13 = vpop.permute.xlu0 %254 }
  0x9c   :  { %v260_v11 = vpop.permute.xlu1 %259 }
  0x9f   :  { %v371_v26 = vpop.permute.xlu0 %370 }
  0xa0   :  { %v376_v24 = vpop.permute.xlu1 %375 }
  0xd9   :  { %v562_v33 = vpop.f32.mrb[0].mxu0 }
  0xda   :  { %v193_v34 = vadd.f32 %v562_v33, %v60_v31  ;;  %v187_v35 = vpop.f32.mrb[1].mxu0  ;;  %v472_v31 = vpop.permute.xlu1 %471 }
  0xdb   :  { %v188_v36 = vadd.f32 %v187_v35, %v55_v29  ;;  %v467_v33 = vpop.permute.xlu0 %466 }
  0xdc   :  { %633 = vtanh.f32 %v193_v34 }
  0xdd   :  { %635 = vtanh.f32 %v188_v36  ;;  %v565_v37 = vpop.f32.mrb[2].mxu0  ;;  %v489_v36 = vlaneseq }
  0xde   :  { %v203_v38 = vadd.f32 %v565_v37, %v70_v32  ;;  %v197_v39 = vpop.f32.mrb[3].mxu0 }
  0xdf   :  { %v198_v41 = vadd.f32 %v197_v39, %v65_v30  ;;  %v490_v39 = vshrl.u32 %v489_v36, 7 }
  0xe0   :  { %637 = vtanh.f32 %v203_v38 }
  0xe1   :  { %639 = vtanh.f32 %v198_v41  ;;  %v568_v43 = vpop.f32.mrb[4].mxu0 }
  0xe2   :  { %v213_v44 = vadd.f32 %v568_v43, %v80_v40  ;;  %v207_v45 = vpop.f32.mrb[5].mxu0 }
  0xe3   :  { %v208_v46 = vadd.f32 %v207_v45, %v75_v42  ;;  %v491_v42 = vsub.s32 0, %v490_v39 }
  0xe4   :  { %641 = vtanh.f32 %v213_v44  ;;  %v487_v44 = vpop.permute.xlu0 %486 }
  0xe5   :  { %643 = vtanh.f32 %v208_v46  ;;  %v571_v48 = vpop.f32.mrb[6].mxu0  ;;  %v492_v46 = vrot.slane %v487_v44, %v491_v42 }
  0xe6   :  { %v634_v49 = vpop.eup %633  ;;  %v223_v51 = vadd.f32 %v571_v48, %v90_v47  ;;  %v217_v52 = vpop.f32.mrb[7].mxu0 }
  0xe7   :  { %v636_v53 = vpop.eup %635  ;;  %v218_v54 = vadd.f32 %v217_v52, %v85_v50 }
  0xe8   :  { %645 = vtanh.f32 %v223_v51  ;;  %v605_v55 = vpack.c.bf16 %v634_v49, %v636_v53 }
  0xe9   :  { %647 = vtanh.f32 %v218_v54 }
  0xea   :  { %v638_v56 = vpop.eup %637  ;;  %606 = vmatprep.subr.bf16.mxu1 %v605_v55 }
  0xeb   :  { %v640_v57 = vpop.eup %639  ;;  %608 = vmatpush3.bf16.msra.mxu1 %v605_v55 }
  0xec   :  { %v609_v58 = vpack.c.bf16 %v638_v56, %v640_v57 }
  0xee   :  { %v642_v59 = vpop.eup %641  ;;  %610 = vmatprep.subr.bf16.mxu1 %v609_v58 }
  0xef   :  { %v644_v60 = vpop.eup %643  ;;  %612 = vmatpush3.bf16.msra.mxu1 %v609_v58 }
  0xf0   :  { %v613_v61 = vpack.c.bf16 %v642_v59, %v644_v60 }
  0xf2   :  { %v646_v62 = vpop.eup %645  ;;  %614 = vmatprep.subr.bf16.mxu1 %v613_v61 }
  0xf3   :  { %v648_v63 = vpop.eup %647  ;;  %616 = vmatpush3.bf16.msra.mxu1 %v613_v61 }
  0xf4   :  { %v617_v0 = vpack.c.bf16 %v646_v62, %v648_v63 }
  0xf6   :  { %618 = vmatprep.subr.bf16.mxu1 %v617_v0 }
  0xf7   :  { %620 = vmatpush3.bf16.msra.mxu1 %v617_v0 }
  0xfa   :  { %589 = vmatmul.mubr.msk.f32.vlgmr.msra.gmra.mrb[0].mxu1 %vm262_vm2, %v235_v1 }
  0xfb   :  { %591 = vmatprep.mubr.msk.f32.mxu1 %vm262_vm2, %v236_v2 }
  0xfe   :  { %592 = vmatmul.mubr.msk.f32.gmra.mrb[2].mxu1 %vm262_vm2, %v237_v3 }
 0x1cd   :  { %v590_v7 = vpop.f32.mrb[0].mxu1 }
 0x1ce   :  { %v347_v8 = vadd.f32 %v590_v7, %v250_v5  ;;  %v341_v9 = vpop.f32.mrb[1].mxu1 }
 0x1cf   :  { %v342_v10 = vadd.f32 %v341_v9, %v245_v6 }
 0x1d0   :  { %649 = vtanh.f32 %v347_v8 }
 0x1d1   :  { %651 = vtanh.f32 %v342_v10  ;;  %v593_v12 = vpop.f32.mrb[2].mxu1 }
 0x1d2   :  { %v357_v14 = vadd.f32 %v593_v12, %v260_v11  ;;  %v351_v15 = vpop.f32.mrb[3].mxu1 }
 0x1d3   :  { %v352_v16 = vadd.f32 %v351_v15, %v255_v13 }
 0x1d4   :  { %653 = vtanh.f32 %v357_v14 }
 0x1d5   :  { %655 = vtanh.f32 %v352_v16 }
 0x1da   :  { %v650_v17 = vpop.eup %649 }
 0x1db   :  { %v652_v18 = vpop.eup %651 }
 0x1dc   :  { %v621_v19 = vpack.c.bf16 %v650_v17, %v652_v18 }
 0x1de   :  { %v654_v20 = vpop.eup %653  ;;  %622 = vmatprep.subr.bf16.mxu0 %v621_v19 }
 0x1df   :  { %v656_v21 = vpop.eup %655  ;;  %624 = vmatpush3.bf16.msra.mxu0 %v621_v19 }
 0x1e0   :  { %v625_v22 = vpack.c.bf16 %v654_v20, %v656_v21 }
 0x1e2   :  { %626 = vmatprep.subr.bf16.mxu0 %v625_v22 }
 0x1e3   :  { %628 = vmatpush3.bf16.msra.mxu0 %v625_v22 }
 0x1e6   :  { %603 = vmatmul.mubr.msk.f32.vlgmr.msra.gmra.mrb[8].mxu0 %vm378_vm3, %v365_v23 }
 0x2b9   :  { %v604_v25 = vpop.f32.mrb[8].mxu0 }
 0x2ba   :  { %v457_v27 = vadd.f32 %v604_v25, %v376_v24  ;;  %v451_v28 = vpop.f32.mrb[9].mxu0 }
 0x2bb   :  { %v452_v29 = vadd.f32 %v451_v28, %v371_v26 }
 0x2bc   :  { %657 = vtanh.f32 %v457_v27 }
 0x2bd   :  { %659 = vtanh.f32 %v452_v29 }
 0x2c6   :  { %v658_v30 = vpop.eup %657 }
 0x2c7   :  { %v660_v32 = vpop.eup %659  ;;  %v475_v34 = vmul.f32 %v658_v30, %v472_v31 }
 0x2c8   :  { %v474_v35 = vmul.f32 %v660_v32, %v467_v33 }
 0x2ca   :  { %v476_v37 = vadd.f32 %v475_v34, %v474_v35 }
 0x2cc   :  { %v477_v38 = vrot.slane %v476_v37, 4 }
 0x2ce   :  { %v478_v40 = vadd.f32 %v477_v38, %v476_v37 }
 0x2d0   :  { %v479_v41 = vrot.slane %v478_v40, 2 }
 0x2d2   :  { %v480_v43 = vadd.f32 %v479_v41, %v478_v40 }
 0x2d4   :  { %v481_v45 = vrot.slane %v480_v43, 1 }
 0x2d6   :  { %v482_v47 = vadd.f32 %v481_v45, %v480_v43 }
 0x2d8   :  { %v493_v48 = vadd.f32 %v492_v46, %v482_v47 }
 0x2da   :  { %v530_v49 = vmul.f32 -1.442695, %v493_v48 }
 0x2dc   :  { %661 = vpow2.f32 %v530_v49 }
 0x2e6   :  { %v662_v50 = vpop.eup %661 }
 0x2e7   :  { %v497_v51 = vadd.f32 1.0, %v662_v50 }
 0x2e9   :  { %663 = vrcp.f32 %v497_v51 }
 0x2f3   :  { %v664_v52 = vpop.eup %663 }
 0x2f4   :  { %500 = vst [vmem:[#allocation3] sm:$0x1] %v664_v52 }
 0x2f5   :  { %676 = shalt.err (!%p673_p4)
}
 0x2f6   :  { %s677_s23 = scalar_lea.hbm %s872_s9, 16 }
 0x2f7   :  { %p678_p5 = scmp.ne.s32.totalorder %s872_s9, %s677_s23  ;;  %p681_p6 = scmp.lt.u32.totalorder %s677_s23, %s872_s9 }
 0x2f9   :  { %p683_p7 = pnand %p681_p6, %p678_p5 }
 0x2fb   :  { %686 = shalt.err (!%p683_p7)
}
 0x2fc   :  { %510 = dma.vmem_to_hbm [thread:$0]  %s508_s19, 16, %s872_s9, [#allocation4]  }
 0x2fd   :  { %687 = dma.done.wait [#allocation4], 16  }
 0x2fe   :  { %688 = vsyncadd [#allocation4], 4294967280 }
 0x2ff   :  { %514 = vsyncpa [#allocation4], 1 }

</bundles_post_ra>
